<compile_context>
chip_gen: v5e
topology: v5e:2x2
jax: 0.10.0
libtpu: 0.0.40
codegen_flags: <defaults>
</compile_context>

<pallas_src>
import jax
import jax.numpy as jnp
from jax.experimental import pallas as pl
from jax.experimental.pallas import tpu as pltpu


# ----------------------------- parameter glue ------------------------------

def gaussian_1d(window_size: int, sigma: float = 1.5) -> jnp.ndarray:
    """Same as the PyTorch `gaussian` helper (deterministic)."""
    x = jnp.arange(window_size, dtype=jnp.float32)
    g = jnp.exp(-((x - window_size // 2) ** 2) / (2.0 * sigma ** 2))
    return g / jnp.sum(g)


def blur_matrix(n: int, g: jnp.ndarray) -> jnp.ndarray:
    """(n, n) band matrix M s.t. (M @ x) == 1-D cross-correlation of x with g
    using zero padding of window//2 (what F.conv2d(padding=ws//2) does)."""
    ws = g.shape[0]
    pad = ws // 2
    i = jnp.arange(n)[:, None]
    k = jnp.arange(n)[None, :]
    idx = k - i + pad
    valid = (idx >= 0) & (idx < ws)
    return jnp.where(valid, g[jnp.clip(idx, 0, ws - 1)], 0.0).astype(jnp.float32)


# ------------------- pass 1: packed per-group SSIM map ----------------------

def ssim_map_kernel(x1_ref, x2_ref, abig_ref, bwt_ref,
                    map_ref, min_ref, max_ref, stacked_ref):
    x1 = x1_ref[...]                      # (H, G*W) f32 — G images packed on lanes
    x2 = x2_ref[...]
    H = x1.shape[0]
    cdt = abig_ref.dtype                  # blur compute dtype (f32 / bf16)

    # Write the five blur operands straight into the (5H, G*W) scratch (no
    # concatenate temporary); the separable Gaussian blur of all of them is
    # then just two MXU matmuls:  kron(I5, A) @ stacked @ kron(I_G, Bw^T).
    stacked_ref[0 * H:1 * H, :] = x1.astype(cdt)
    stacked_ref[1 * H:2 * H, :] = x2.astype(cdt)
    stacked_ref[2 * H:3 * H, :] = (x1 * x1).astype(cdt)
    stacked_ref[3 * H:4 * H, :] = (x2 * x2).astype(cdt)
    stacked_ref[4 * H:5 * H, :] = (x1 * x2).astype(cdt)

    rowb = jnp.dot(abig_ref[...], stacked_ref[...],
                   preferred_element_type=jnp.float32)                 # (5H, G*W)
    blurred = jnp.dot(rowb.astype(cdt), bwt_ref[...],
                      preferred_element_type=jnp.float32)              # (5H, G*W)

    mu1 = blurred[0 * H:1 * H]
    mu2 = blurred[1 * H:2 * H]
    e11 = blurred[2 * H:3 * H]
    e22 = blurred[3 * H:4 * H]
    e12 = blurred[4 * H:5 * H]

    mu1_sq = mu1 * mu1
    mu2_sq = mu2 * mu2
    mu1_mu2 = mu1 * mu2
    sigma1_sq = e11 - mu1_sq              # f32 subtraction (cancellation-safe)
    sigma2_sq = e22 - mu2_sq
    sigma12 = e12 - mu1_mu2

    c1 = 0.01 ** 2
    c2 = 0.03 ** 2
    num = (2.0 * mu1_mu2 + c1) * (2.0 * sigma12 + c2)
    den = (mu1_sq + mu2_sq + c1) * (sigma1_sq + sigma2_sq + c2)
    ssim = num / den                      # exact divide: -log near the map min
                                          # is too error-sensitive for approx

    map_ref[...] = ssim                   # lane-dense store (G*W lanes)

    # Per-step (per packed group) min/max: sublane reduce, then one lane reduce.
    col_min = jnp.min(ssim, axis=0, keepdims=True)           # (1, G*W)
    col_max = jnp.max(ssim, axis=0, keepdims=True)
    min_ref[...] = jnp.min(col_min, axis=1, keepdims=True)   # (1, 1)
    max_ref[...] = jnp.max(col_max, axis=1, keepdims=True)   # (1, 1)


# ------------------------------ host wrapper -------------------------------

def logssim(img1: jnp.ndarray, img2: jnp.ndarray, window_size: int = 11,
            blur_dtype=jnp.float32, target_lanes: int = 256) -> jnp.ndarray:
    """Equivalent of LOGSSIM(window_size, size_average=True)(img1, img2)."""
    B, C, H, W = img1.shape
    BC = B * C

    # Pack G images along the lane dimension (aim for >=256 lanes on v6e/v7x,
    # 128 on v5e; clamp to what BC/W allow and keep BC % G == 0).
    G = max(1, min(BC, target_lanes // max(W, 1)))
    while BC % G != 0:
        G -= 1
    GW = G * W
    NS = BC // G                                           # grid steps

    g = gaussian_1d(window_size, 1.5)
    A = blur_matrix(H, g)                                  # (H, H)
    Bw = blur_matrix(W, g)                                 # (W, W)
    # TODO(synk): above roughly H ~ 180-256 drop kron(I5, A) (100*H^2 bytes of
    # resident weight) and issue 5 matmuls with a single (H,H) A instead,
    # especially on v7x (64 MiB VMEM).
    abig = jnp.kron(jnp.eye(5, dtype=jnp.float32), A).astype(blur_dtype)   # (5H, 5H)
    # Block-diagonal column blur so packed images never mix.
    bwt = jnp.kron(jnp.eye(G, dtype=jnp.float32), Bw.T).astype(blur_dtype)  # (GW, GW)

    def pack(x):   # (BC, H, W) -> (NS, H, G*W): lane-dense layout plumbing
        x = x.reshape(NS, G, H, W)
        x = jnp.transpose(x, (0, 2, 1, 3))
        return x.reshape(NS, H, GW).astype(jnp.float32)

    x1 = pack(img1.reshape(BC, H, W))
    x2 = pack(img2.reshape(BC, H, W))

    # ---- pass 1: SSIM map + per-step min/max, parallel over packed groups ----
    maps, mins, maxs = pl.pallas_call(
        ssim_map_kernel,
        grid=(NS,),
        in_specs=[
            pl.BlockSpec((None, H, GW), lambda i: (i, 0, 0)),
            pl.BlockSpec((None, H, GW), lambda i: (i, 0, 0)),
            pl.BlockSpec((5 * H, 5 * H), lambda i: (0, 0)),
            pl.BlockSpec((GW, GW), lambda i: (0, 0)),
        ],
        out_specs=(
            pl.BlockSpec((None, H, GW), lambda i: (i, 0, 0)),
            pl.BlockSpec((None, 1, 1), lambda i: (i, 0, 0)),
            pl.BlockSpec((None, 1, 1), lambda i: (i, 0, 0)),
        ),
        out_shape=(
            jax.ShapeDtypeStruct((NS, H, GW), jnp.float32),
            jax.ShapeDtypeStruct((NS, 1, 1), jnp.float32),
            jax.ShapeDtypeStruct((NS, 1, 1), jnp.float32),
        ),
        scratch_shapes=[pltpu.VMEM((5 * H, GW), blur_dtype)],
        compiler_params=pltpu.CompilerParams(dimension_semantics=("parallel",)),
    )(x1, x2, abig, bwt)

    # Loop-invariant global min/max and 1/(max-min): hoisted out of pass 2
    # (tiny XLA reduction + one scalar divide), handed to the kernel via SMEM.
    mn = jnp.min(mins)
    mx = jnp.max(maxs)
    # TODO(synk): mx == mn (constant ssim map, e.g. img1 == img2) gives NaN
    # exactly like the PyTorch reference; a production guard would clamp.
    scal = jnp.stack([mn, 1.0 / (mx - mn)]).astype(jnp.float32)   # (2,) SMEM

    inv_n = 1.0 / float(BC * H * W)

    # ---- pass 2: normalize -> -log -> mean (sequential accumulation) ----
    # TODO(synk): on v7x pass 2 could be split across the two TensorCores
    # (leading core-parallel grid axis + per-core partial sums); kept serial
    # here for simplicity (no effect on v5e/v6e).
    def finalize_kernel(scal_ref, map_ref, out_ref, acc_ref):
        i = pl.program_id(0)

        @pl.when(i == 0)
        def _():
            acc_ref[...] = jnp.zeros_like(acc_ref)

        mn_s = scal_ref[0]                # SMEM scalars, loop-invariant
        inv_range = scal_ref[1]
        norm = (map_ref[...] - mn_s) * inv_range        # (H, G*W) lane-dense
        neg_log = -jnp.log(norm + 1e-8)
        # Per-lane partial sums in f32 (pairwise-ish accumulation tree).
        acc_ref[...] += jnp.sum(neg_log, axis=0, keepdims=True)   # (1, G*W)

        @pl.when(i == pl.num_programs(0) - 1)
        def _():
            # size_average=True path (module default).
            # TODO(synk): size_average=False (per-batch-element mean) is not
            # implemented; it would need per-image partial sums instead of one
            # accumulated scalar.
            out_ref[...] = jnp.sum(acc_ref[...], axis=1, keepdims=True) * inv_n

    out = pl.pallas_call(
        finalize_kernel,
        grid=(NS,),
        in_specs=[
            pl.BlockSpec(memory_space=pltpu.MemorySpace.SMEM),
            pl.BlockSpec((None, H, GW), lambda i: (i, 0, 0)),
        ],
        out_specs=pl.BlockSpec((1, 1), lambda i: (0, 0)),
        out_shape=jax.ShapeDtypeStruct((1, 1), jnp.float32),
        scratch_shapes=[pltpu.VMEM((1, GW), jnp.float32)],
        compiler_params=pltpu.CompilerParams(dimension_semantics=("arbitrary",)),
    )(scal, maps)

    return out[0, 0]


# -------------------------- pure-JAX reference -----------------------------

def logssim_ref(img1, img2, window_size=11):
    B, C, H, W = img1.shape
    g = gaussian_1d(window_size, 1.5)
    A = blur_matrix(H, g)
    Bw = blur_matrix(W, g)

    def blur(x):
        return jnp.einsum('hk,bckw,jw->bchj', A, x.astype(jnp.float32), Bw)

    mu1, mu2 = blur(img1), blur(img2)
    mu1_sq, mu2_sq, mu1_mu2 = mu1 * mu1, mu2 * mu2, mu1 * mu2
    s1 = blur(img1 * img1) - mu1_sq
    s2 = blur(img2 * img2) - mu2_sq
    s12 = blur(img1 * img2) - mu1_mu2
    c1, c2 = 0.01 ** 2, 0.03 ** 2
    m = ((2 * mu1_mu2 + c1) * (2 * s12 + c2)) / ((mu1_sq + mu2_sq + c1) * (s1 + s2 + c2))
    m = (m - jnp.min(m)) / (jnp.max(m) - jnp.min(m))
    return jnp.mean(-jnp.log(m + 1e-8))


# --------------------------------- main -------------------------------------

if __name__ == "__main__":
    key = jax.random.PRNGKey(0)
    k1, k2 = jax.random.split(key)
    B, C, H, W = 2, 4, 16, 16
    img1 = jax.random.uniform(k1, (B, C, H, W), dtype=jnp.float32)
    img2 = jax.random.uniform(k2, (B, C, H, W), dtype=jnp.float32)

    out = jax.block_until_ready(logssim(img1, img2, window_size=11))
    ref = jax.block_until_ready(logssim_ref(img1, img2, window_size=11))

    assert jnp.isfinite(out), "kernel produced non-finite output"
    # With the exact f32 divide the only remaining deviation from the exact-f32
    # reference is matmul-order rounding; observed error is O(1e-3) or better
    # even through the -log amplification near the map minimum. 1e-2 gives
    # margin.
    assert abs(float(out) - float(ref)) < 1e-2 * max(1.0, abs(float(ref))), (
        f"mismatch: kernel={float(out)} ref={float(ref)}")
    print("KERNEL_OK")
</pallas_src>

<mosaic_0001>
module attributes {stable_mosaic.version = 11 : i64} {
  func.func @ssim_map_kernel(%arg0: i32, %arg1: memref<1x16x128xf32, #tpu.memory_space<vmem>>, %arg2: memref<1x16x128xf32, #tpu.memory_space<vmem>>, %arg3: memref<80x80xf32, #tpu.memory_space<vmem>>, %arg4: memref<128x128xf32, #tpu.memory_space<vmem>>, %arg5: memref<1x16x128xf32, #tpu.memory_space<vmem>>, %arg6: memref<1x1x1xf32, #tpu.memory_space<vmem>>, %arg7: memref<1x1x1xf32, #tpu.memory_space<vmem>>, %arg8: memref<80x128xf32, #tpu.memory_space<vmem>>) attributes {dimension_semantics = [#tpu.dimension_semantics<parallel>], iteration_bounds = array<i64: 1>, scalar_prefetch = 0 : i64, scratch_operands = 1 : i64, tpu.core_type = #tpu.core_type<tc>, window_params = [{transform_indices = @transform_0, window_bounds = array<i64: 1, 16, 128>}, {transform_indices = @transform_1, window_bounds = array<i64: 1, 16, 128>}, {pipeline_mode = #tpu.pipeline_mode<synchronous>, transform_indices = @transform_2, window_bounds = array<i64: 80, 80>}, {pipeline_mode = #tpu.pipeline_mode<synchronous>, transform_indices = @transform_3, window_bounds = array<i64: 128, 128>}, {transform_indices = @transform_4, window_bounds = array<i64: 1, 16, 128>}, {transform_indices = @transform_5, window_bounds = array<i64: 1, 1, 1>}, {transform_indices = @transform_6, window_bounds = array<i64: 1, 1, 1>}]} {
    %c0 = arith.constant 0 : index
    %c0_0 = arith.constant 0 : index
    %c0_1 = arith.constant 0 : index
    %0 = vector.load %arg1[%c0, %c0_0, %c0_1] : memref<1x16x128xf32, #tpu.memory_space<vmem>>, vector<1x16x128xf32>
    %1 = vector.shape_cast %0 : vector<1x16x128xf32> to vector<16x128xf32>
    %c0_2 = arith.constant 0 : index
    %c0_3 = arith.constant 0 : index
    %c0_4 = arith.constant 0 : index
    %2 = vector.load %arg2[%c0_2, %c0_3, %c0_4] : memref<1x16x128xf32, #tpu.memory_space<vmem>>, vector<1x16x128xf32>
    %3 = vector.shape_cast %2 : vector<1x16x128xf32> to vector<16x128xf32>
    %c0_5 = arith.constant 0 : index
    %c0_6 = arith.constant 0 : index
    %4 = vector.load %arg8[%c0_5, %c0_6] : memref<80x128xf32, #tpu.memory_space<vmem>>, vector<16x128xf32>
    tpu.vector_store %arg8[%c0_5, %c0_6], %1 {strides = array<i32>} : memref<80x128xf32, #tpu.memory_space<vmem>>, vector<16x128xf32>,
    %c16 = arith.constant 16 : index
    %c0_7 = arith.constant 0 : index
    %5 = vector.load %arg8[%c16, %c0_7] : memref<80x128xf32, #tpu.memory_space<vmem>>, vector<16x128xf32>
    tpu.vector_store %arg8[%c16, %c0_7], %3 {strides = array<i32>} : memref<80x128xf32, #tpu.memory_space<vmem>>, vector<16x128xf32>,
    %6 = arith.mulf %1, %1 : vector<16x128xf32>
    %c32 = arith.constant 32 : index
    %c0_8 = arith.constant 0 : index
    %7 = vector.load %arg8[%c32, %c0_8] : memref<80x128xf32, #tpu.memory_space<vmem>>, vector<16x128xf32>
    tpu.vector_store %arg8[%c32, %c0_8], %6 {strides = array<i32>} : memref<80x128xf32, #tpu.memory_space<vmem>>, vector<16x128xf32>,
    %8 = arith.mulf %3, %3 : vector<16x128xf32>
    %c48 = arith.constant 48 : index
    %c0_9 = arith.constant 0 : index
    %9 = vector.load %arg8[%c48, %c0_9] : memref<80x128xf32, #tpu.memory_space<vmem>>, vector<16x128xf32>
    tpu.vector_store %arg8[%c48, %c0_9], %8 {strides = array<i32>} : memref<80x128xf32, #tpu.memory_space<vmem>>, vector<16x128xf32>,
    %10 = arith.mulf %1, %3 : vector<16x128xf32>
    %c64 = arith.constant 64 : index
    %c0_10 = arith.constant 0 : index
    %11 = vector.load %arg8[%c64, %c0_10] : memref<80x128xf32, #tpu.memory_space<vmem>>, vector<16x128xf32>
    tpu.vector_store %arg8[%c64, %c0_10], %10 {strides = array<i32>} : memref<80x128xf32, #tpu.memory_space<vmem>>, vector<16x128xf32>,
    %c0_11 = arith.constant 0 : index
    %c0_12 = arith.constant 0 : index
    %12 = vector.load %arg3[%c0_11, %c0_12] : memref<80x80xf32, #tpu.memory_space<vmem>>, vector<80x80xf32>
    %c0_13 = arith.constant 0 : index
    %c0_14 = arith.constant 0 : index
    %13 = vector.load %arg8[%c0_13, %c0_14] : memref<80x128xf32, #tpu.memory_space<vmem>>, vector<80x128xf32>
    %cst = arith.constant dense<0.000000e+00> : vector<80x128xf32>
    %14 = tpu.matmul %12, %13, %cst {dimension_numbers = #tpu.dot_dimension_numbers<[1], [0], [0], [1], [0, 0, 1, 1], [], []>} : vector<80x80xf32>, vector<80x128xf32>, vector<80x128xf32> -> vector<80x128xf32>
    %c0_15 = arith.constant 0 : index
    %c0_16 = arith.constant 0 : index
    %15 = vector.load %arg4[%c0_15, %c0_16] : memref<128x128xf32, #tpu.memory_space<vmem>>, vector<128x128xf32>
    %cst_17 = arith.constant dense<0.000000e+00> : vector<80x128xf32>
    %16 = tpu.matmul %14, %15, %cst_17 {dimension_numbers = #tpu.dot_dimension_numbers<[1], [0], [0], [1], [0, 0, 1, 1], [], []>} : vector<80x128xf32>, vector<128x128xf32>, vector<80x128xf32> -> vector<80x128xf32>
    %17 = vector.extract_strided_slice %16 {offsets = [0, 0], sizes = [16, 128], strides = [1, 1]} : vector<80x128xf32> to vector<16x128xf32>
    %18 = vector.extract_strided_slice %16 {offsets = [16, 0], sizes = [16, 128], strides = [1, 1]} : vector<80x128xf32> to vector<16x128xf32>
    %19 = vector.extract_strided_slice %16 {offsets = [32, 0], sizes = [16, 128], strides = [1, 1]} : vector<80x128xf32> to vector<16x128xf32>
    %20 = vector.extract_strided_slice %16 {offsets = [48, 0], sizes = [16, 128], strides = [1, 1]} : vector<80x128xf32> to vector<16x128xf32>
    %21 = vector.extract_strided_slice %16 {offsets = [64, 0], sizes = [16, 128], strides = [1, 1]} : vector<80x128xf32> to vector<16x128xf32>
    %22 = arith.mulf %17, %17 : vector<16x128xf32>
    %23 = arith.mulf %18, %18 : vector<16x128xf32>
    %24 = arith.mulf %17, %18 : vector<16x128xf32>
    %25 = arith.subf %19, %22 : vector<16x128xf32>
    %26 = arith.subf %20, %23 : vector<16x128xf32>
    %27 = arith.subf %21, %24 : vector<16x128xf32>
    %cst_18 = arith.constant 2.000000e+00 : f32
    %28 = vector.broadcast %cst_18 : f32 to vector<16x128xf32>
    %29 = arith.mulf %28, %24 : vector<16x128xf32>
    %cst_19 = arith.constant 9.99999974E-5 : f32
    %30 = vector.broadcast %cst_19 : f32 to vector<16x128xf32>
    %31 = arith.addf %29, %30 : vector<16x128xf32>
    %cst_20 = arith.constant 2.000000e+00 : f32
    %32 = vector.broadcast %cst_20 : f32 to vector<16x128xf32>
    %33 = arith.mulf %32, %27 : vector<16x128xf32>
    %cst_21 = arith.constant 8.99999984E-4 : f32
    %34 = vector.broadcast %cst_21 : f32 to vector<16x128xf32>
    %35 = arith.addf %33, %34 : vector<16x128xf32>
    %36 = arith.mulf %31, %35 : vector<16x128xf32>
    %37 = arith.addf %22, %23 : vector<16x128xf32>
    %cst_22 = arith.constant 9.99999974E-5 : f32
    %38 = vector.broadcast %cst_22 : f32 to vector<16x128xf32>
    %39 = arith.addf %37, %38 : vector<16x128xf32>
    %40 = arith.addf %25, %26 : vector<16x128xf32>
    %cst_23 = arith.constant 8.99999984E-4 : f32
    %41 = vector.broadcast %cst_23 : f32 to vector<16x128xf32>
    %42 = arith.addf %40, %41 : vector<16x128xf32>
    %43 = arith.mulf %39, %42 : vector<16x128xf32>
    %44 = arith.divf %36, %43 : vector<16x128xf32>
    %c0_24 = arith.constant 0 : index
    %c0_25 = arith.constant 0 : index
    %c0_26 = arith.constant 0 : index
    %45 = vector.load %arg5[%c0_24, %c0_25, %c0_26] : memref<1x16x128xf32, #tpu.memory_space<vmem>>, vector<1x16x128xf32>
    %46 = vector.shape_cast %45 : vector<1x16x128xf32> to vector<16x128xf32>
    %47 = vector.shape_cast %44 : vector<16x128xf32> to vector<1x16x128xf32>
    tpu.vector_store %arg5[%c0_24, %c0_25, %c0_26], %47 {strides = array<i32>} : memref<1x16x128xf32, #tpu.memory_space<vmem>>, vector<1x16x128xf32>,
    %cst_27 = arith.constant dense<0x7F800000> : vector<128xf32>
    %48 = vector.multi_reduction <minimumf>, %44, %cst_27 [0] : vector<16x128xf32> to vector<128xf32>
    %49 = vector.shape_cast %48 : vector<128xf32> to vector<1x128xf32>
    %cst_28 = arith.constant dense<0xFF800000> : vector<128xf32>
    %50 = vector.multi_reduction <maximumf>, %44, %cst_28 [0] : vector<16x128xf32> to vector<128xf32>
    %51 = vector.shape_cast %50 : vector<128xf32> to vector<1x128xf32>
    %cst_29 = arith.constant dense<0x7F800000> : vector<1xf32>
    %52 = vector.multi_reduction <minimumf>, %49, %cst_29 [1] : vector<1x128xf32> to vector<1xf32>
    %53 = vector.shape_cast %52 : vector<1xf32> to vector<1x1xf32>
    %c0_30 = arith.constant 0 : index
    %c0_31 = arith.constant 0 : index
    %c0_32 = arith.constant 0 : index
    %54 = vector.load %arg6[%c0_30, %c0_31, %c0_32] : memref<1x1x1xf32, #tpu.memory_space<vmem>>, vector<1x1x1xf32>
    %55 = vector.shape_cast %54 : vector<1x1x1xf32> to vector<1x1xf32>
    %56 = vector.shape_cast %53 : vector<1x1xf32> to vector<1x1x1xf32>
    tpu.vector_store %arg6[%c0_30, %c0_31, %c0_32], %56 {strides = array<i32>} : memref<1x1x1xf32, #tpu.memory_space<vmem>>, vector<1x1x1xf32>,
    %cst_33 = arith.constant dense<0xFF800000> : vector<1xf32>
    %57 = vector.multi_reduction <maximumf>, %51, %cst_33 [1] : vector<1x128xf32> to vector<1xf32>
    %58 = vector.shape_cast %57 : vector<1xf32> to vector<1x1xf32>
    %c0_34 = arith.constant 0 : index
    %c0_35 = arith.constant 0 : index
    %c0_36 = arith.constant 0 : index
    %59 = vector.load %arg7[%c0_34, %c0_35, %c0_36] : memref<1x1x1xf32, #tpu.memory_space<vmem>>, vector<1x1x1xf32>
    %60 = vector.shape_cast %59 : vector<1x1x1xf32> to vector<1x1xf32>
    %61 = vector.shape_cast %58 : vector<1x1xf32> to vector<1x1x1xf32>
    tpu.vector_store %arg7[%c0_34, %c0_35, %c0_36], %61 {strides = array<i32>} : memref<1x1x1xf32, #tpu.memory_space<vmem>>, vector<1x1x1xf32>,
    return
  }
  func.func @transform_0(%arg0: i32) -> (i32, i32, i32) {
    %c0_i32 = arith.constant 0 : i32
    %c0_i32_0 = arith.constant 0 : i32
    %c0_i32_1 = arith.constant 0 : i32
    return %arg0, %c0_i32, %c0_i32_0 : i32, i32, i32
  }
  func.func @transform_1(%arg0: i32) -> (i32, i32, i32) {
    %c0_i32 = arith.constant 0 : i32
    %c0_i32_0 = arith.constant 0 : i32
    %c0_i32_1 = arith.constant 0 : i32
    return %arg0, %c0_i32, %c0_i32_0 : i32, i32, i32
  }
  func.func @transform_2(%arg0: i32) -> (i32, i32) {
    %c0_i32 = arith.constant 0 : i32
    %c0_i32_0 = arith.constant 0 : i32
    %c0_i32_1 = arith.constant 0 : i32
    return %c0_i32, %c0_i32_0 : i32, i32
  }
  func.func @transform_3(%arg0: i32) -> (i32, i32) {
    %c0_i32 = arith.constant 0 : i32
    %c0_i32_0 = arith.constant 0 : i32
    %c0_i32_1 = arith.constant 0 : i32
    return %c0_i32, %c0_i32_0 : i32, i32
  }
  func.func @transform_4(%arg0: i32) -> (i32, i32, i32) {
    %c0_i32 = arith.constant 0 : i32
    %c0_i32_0 = arith.constant 0 : i32
    %c0_i32_1 = arith.constant 0 : i32
    return %arg0, %c0_i32, %c0_i32_0 : i32, i32, i32
  }
  func.func @transform_5(%arg0: i32) -> (i32, i32, i32) {
    %c0_i32 = arith.constant 0 : i32
    %c0_i32_0 = arith.constant 0 : i32
    %c0_i32_1 = arith.constant 0 : i32
    return %arg0, %c0_i32, %c0_i32_0 : i32, i32, i32
  }
  func.func @transform_6(%arg0: i32) -> (i32, i32, i32) {
    %c0_i32 = arith.constant 0 : i32
    %c0_i32_0 = arith.constant 0 : i32
    %c0_i32_1 = arith.constant 0 : i32
    return %arg0, %c0_i32, %c0_i32_0 : i32, i32, i32
  }
}

</mosaic_0001>

<bundles_post_ra>
// kernel: tpu_custom_call.1
= control target key start
LH: loop header
LB: loop body
LE: loop exit
PB: predicated region body
PF: predicated region fallthrough
CT: control target
= control target key end

     0   :  { %12 = vsyncpa [#allocation4], 0  ;;  %s736_s0 = inlined_call_operand.hbm [shape: f32[1,16,128], index: 0, kind: input, shape index: {}]   ;;  %s737_s1 = inlined_call_operand.hbm [shape: f32[1,16,128], index: 1, kind: input, shape index: {}]   ;;  %s738_s2 = inlined_call_operand.hbm [shape: f32[80,80], index: 2, kind: input, shape index: {}]   ;;  %s739_s3 = inlined_call_operand.hbm [shape: f32[128,128], index: 3, kind: input, shape index: {}]   ;;  %s740_s4 = inlined_call_operand.hbm [shape: f32[1,16,128], index: 4, kind: output, shape index: {0}]   ;;  %s741_s5 = inlined_call_operand.hbm [shape: f32[1,1,1], index: 5, kind: output, shape index: {1}]   ;;  %s742_s6 = inlined_call_operand.hbm [shape: f32[1,1,1], index: 6, kind: output, shape index: {2}]  }
   0x1   :  { %13 = vsyncpa [#allocation7], 0 }
   0x2   :  { %14 = vsyncpa [#allocation10], 0 }
   0x3   :  { %15 = vsyncpa [#allocation5], 0 }
   0x4   :  { %16 = vsyncpa [#allocation13], 0  ;;  %s34_s23 = sshll.u32 %s737_s1, 4  ;;  %s646_s24 = smov [#allocation6]   ;;  %s35_s23 = int_to_ptr.hbm [resolvable:$true] %s34_s23 }
   0x5   :  { %s36_s25 = sshll.u32 %s646_s24, 4  ;;  %s21_s28 = sshll.u32 %s736_s0, 4  ;;  %s37_s25 = int_to_ptr.vmem [resolvable:$true] %s36_s25  ;;  %s22_s28 = int_to_ptr.hbm [resolvable:$true] %s21_s28 }
   0x6   :  { %s647_s29 = smov 128   ;;  %s648_s30 = smov 8  }
   0x7   :  { %42 = dma.hbm_to_vmem [thread:$0]  %s35_s23, 256, %s37_s25, [#allocation7], %s647_s29, %s647_s29, %s648_s30  }
   0x8   :  { %s649_s7 = smov [#allocation3]   ;;  %s47_s1 = sshll.u32 %s738_s2, 4  ;;  %s48_s1 = int_to_ptr.hbm [resolvable:$true] %s47_s1 }
   0x9   :  { %s23_s8 = sshll.u32 %s649_s7, 4  ;;  %s60_s12 = sshll.u32 %s739_s3, 4  ;;  %s24_s8 = int_to_ptr.vmem [resolvable:$true] %s23_s8  ;;  %s61_s12 = int_to_ptr.hbm [resolvable:$true] %s60_s12 }
   0xa   :  { %29 = dma.hbm_to_vmem [thread:$0]  %s22_s28, 256, %s24_s8, [#allocation4], %s647_s29, %s647_s29, %s648_s30  }
   0xb   :  { %s650_s13 = smov [#allocation8]   ;;  %s651_s15 = smov [#allocation9]  }
   0xc   :  { %s49_s14 = sshll.u32 %s650_s13, 4  ;;  %s62_s2 = sshll.u32 %s651_s15, 4  ;;  %s50_s14 = int_to_ptr.vmem [resolvable:$true] %s49_s14  ;;  %s63_s2 = int_to_ptr.vmem [resolvable:$true] %s62_s2 }
   0xd   :  { %55 = dma.hbm_to_vmem [thread:$0]  %s48_s1, 1280, %s50_s14, [#allocation7], %s647_s29, %s647_s29, %s648_s30  }
   0xe   :  { %68 = dma.hbm_to_vmem [thread:$0]  %s61_s12, 2048, %s63_s2, [#allocation10], %s647_s29, %s647_s29, %s648_s30  }
   0xf   :  { %636 = dma.done.wait [#allocation4], 256  }
  0x10   :  { %637 = vsyncadd [#allocation4], 4294967040 }
  0x11   :  { %638 = dma.done.wait [#allocation7], 1536  }
  0x12   :  { %639 = vsyncadd [#allocation7], 4294965760 }
  0x13   :  { %640 = dma.done.wait [#allocation10], 2048  }
  0x14   :  { %641 = vsyncadd [#allocation10], 4294965248  ;;  %v86_v0 = vld [vmem:[#allocation3 + $0x8] sm:$0xff]  ;;  %v88_v1 = vld [vmem:[#allocation6 + $0x8] sm:$0xff]  ;;  %vm125_vm0 = vcmask 654336   ;;  %s357_s17 = sshll.u32 %s740_s4, 4  ;;  %s358_s17 = int_to_ptr.hbm [resolvable:$true] %s357_s17 }
  0x15   :  { %v85_v2 = vld [vmem:[#allocation3] sm:$0xff]  ;;  %v102_v3 = vmul.f32 %v88_v1, %v86_v0  ;;  %v87_v4 = vld [vmem:[#allocation6] sm:$0xff]  ;;  %v98_v6 = vmul.f32 %v88_v1, %v88_v1  ;;  %v94_v8 = vmul.f32 %v86_v0, %v86_v0  ;;  %v106_v12 = vld [vmem:[#allocation8 + $0x8] sm:$0xff]  ;;  %s652_s18 = smov [#allocation11]   ;;  %s653_s20 = smov [#allocation12]   ;;  %vm346_vm9 = vcmask 0  }
  0x16   :  { %v101_v5 = vmul.f32 %v87_v4, %v85_v2  ;;  %v97_v7 = vmul.f32 %v87_v4, %v87_v4  ;;  %v93_v9 = vmul.f32 %v85_v2, %v85_v2  ;;  %v105_v10 = vld [vmem:[#allocation8] sm:$0xff]  ;;  %v111_v11 = vld [vmem:[#allocation8 + $0x30] sm:$0xff]  ;;  %v112_v13 = vld [vmem:[#allocation8 + $0x38] sm:$0xff]  ;;  %s355_s19 = sshll.u32 %s652_s18, 4  ;;  %s369_s21 = sshll.u32 %s653_s20, 4  ;;  %s356_s19 = int_to_ptr.vmem [resolvable:$true] %s355_s19  ;;  %s370_s21 = int_to_ptr.vmem [resolvable:$true] %s369_s21 }
  0x17   :  { %162 = vmatpush.msra.mxu0 %v102_v3  ;;  %413 = vmatpush.msra.mxu3 %v102_v3  ;;  %v218_v14 = vld [vmem:[#allocation9 + $0x78] sm:$0xff]  ;;  %v217_v15 = vld [vmem:[#allocation9 + $0x70] sm:$0xff]  ;;  %v216_v16 = vld [vmem:[#allocation9 + $0x68] sm:$0xff]  ;;  %s371_s4 = sshll.u32 %s741_s5, 4  ;;  %s654_s24 = smov [#allocation14]   ;;  %s372_s4 = int_to_ptr.hbm [resolvable:$true] %s371_s4 }
  0x18   :  { %219 = vmatpush.msra.mxu1 %v218_v14  ;;  %423 = vmatpush.msra.mxu2 %v218_v14  ;;  %v215_v17 = vld [vmem:[#allocation9 + $0x60] sm:$0xff]  ;;  %v113_v19 = vld [vmem:[#allocation8 + $0x40] sm:$0xff]  ;;  %v214_v20 = vld [vmem:[#allocation9 + $0x58] sm:$0xff]  ;;  %s380_s25 = sshll.u32 %s654_s24, 4  ;;  %s382_s28 = sshll.u32 %s742_s6, 4  ;;  %s381_s25 = int_to_ptr.vmem [resolvable:$true] %s380_s25  ;;  %s383_s28 = int_to_ptr.hbm [resolvable:$true] %s382_s28 }
  0x19   :  { %163 = vmatpush.msra.mxu0 %v101_v5  ;;  %414 = vmatpush.msra.mxu3 %v101_v5  ;;  %v107_v18 = vld [vmem:[#allocation8 + $0x10] sm:$0xff]  ;;  %v213_v21 = vld [vmem:[#allocation9 + $0x50] sm:$0xff]  ;;  %v212_v22 = vld [vmem:[#allocation9 + $0x48] sm:$0xff] }
  0x1a   :  { %220 = vmatpush.msra.mxu1 %v217_v15  ;;  %425 = vmatpush.msra.mxu2 %v217_v15  ;;  %v211_v23 = vld [vmem:[#allocation9 + $0x40] sm:$0xff]  ;;  %v108_v24 = vld [vmem:[#allocation8 + $0x18] sm:$0xff]  ;;  %v114_v25 = vld [vmem:[#allocation8 + $0x48] sm:$0xff] }
  0x1b   :  { %164 = vmatpush.msra.mxu0 %v98_v6  ;;  %415 = vmatpush.msra.mxu3 %v98_v6  ;;  %v210_v26 = vld [vmem:[#allocation9 + $0x38] sm:$0xff]  ;;  %v209_v27 = vld [vmem:[#allocation9 + $0x30] sm:$0xff]  ;;  %v208_v28 = vld [vmem:[#allocation9 + $0x28] sm:$0xff] }
  0x1c   :  { %221 = vmatpush.msra.mxu1 %v216_v16  ;;  %427 = vmatpush.msra.mxu2 %v216_v16  ;;  %v207_v29 = vld [vmem:[#allocation9 + $0x20] sm:$0xff]  ;;  %v109_v30 = vld [vmem:[#allocation8 + $0x20] sm:$0xff]  ;;  %v206_v31 = vld [vmem:[#allocation9 + $0x18] sm:$0xff] }
  0x1d   :  { %165 = vmatpush.msra.mxu0 %v97_v7  ;;  %416 = vmatpush.msra.mxu3 %v97_v7  ;;  %v205_v32 = vld [vmem:[#allocation9 + $0x10] sm:$0xff]  ;;  %v204_v33 = vld [vmem:[#allocation9 + $0x8] sm:$0xff]  ;;  %v110_v34 = vld [vmem:[#allocation8 + $0x28] sm:$0xff] }
  0x1e   :  { %222 = vmatpush.msra.mxu1 %v215_v17  ;;  %429 = vmatpush.msra.mxu2 %v215_v17  ;;  %v203_v35 = vld [vmem:[#allocation9] sm:$0xff] }
  0x1f   :  { %166 = vmatpush.msra.mxu0 %v94_v8  ;;  %417 = vmatpush.msra.mxu3 %v94_v8 }
  0x20   :  { %223 = vmatpush.msra.mxu1 %v214_v20  ;;  %431 = vmatpush.msra.mxu2 %v214_v20 }
  0x21   :  { %167 = vmatpush.msra.mxu0 %v93_v9  ;;  %418 = vmatpush.msra.mxu3 %v93_v9 }
  0x22   :  { %224 = vmatpush.msra.mxu1 %v213_v21  ;;  %433 = vmatpush.msra.mxu2 %v213_v21 }
  0x23   :  { %168 = vmatpush.msra.mxu0 %v88_v1  ;;  %419 = vmatpush.msra.mxu3 %v88_v1 }
  0x24   :  { %225 = vmatpush.msra.mxu1 %v212_v22  ;;  %435 = vmatpush.msra.mxu2 %v212_v22 }
  0x25   :  { %169 = vmatpush.msra.mxu0 %v87_v4  ;;  %420 = vmatpush.msra.mxu3 %v87_v4 }
  0x26   :  { %226 = vmatpush.msra.mxu1 %v211_v23  ;;  %437 = vmatpush.msra.mxu2 %v211_v23 }
  0x27   :  { %170 = vmatpush.msra.mxu0 %v86_v0  ;;  %421 = vmatpush.msra.mxu3 %v86_v0 }
  0x28   :  { %227 = vmatpush.msra.mxu1 %v210_v26  ;;  %439 = vmatpush.msra.mxu2 %v210_v26 }
  0x29   :  { %171 = vmatpush.msra.mxu0 %v85_v2  ;;  %422 = vmatpush.msra.mxu3 %v85_v2 }
  0x2a   :  { %403 = vmatmul.msk.f32.vlgmr.msra.gmra.mxu0 %vm125_vm0, %v105_v10  ;;  %409 = vmatmul.msk.f32.vlgmr.msra.gmra.mxu3 %vm125_vm0, %v111_v11 }
  0x2b   :  { %424 = vmatpush.msrb.mxu3 %v218_v14  ;;  %228 = vmatpush.msra.mxu1 %v209_v27 }
  0x2c   :  { %441 = vmatpush.msra.mxu2 %v209_v27 }
  0x2d   :  { %426 = vmatpush.msrb.mxu3 %v217_v15  ;;  %229 = vmatpush.msra.mxu1 %v208_v28 }
  0x2e   :  { %443 = vmatpush.msra.mxu2 %v208_v28 }
  0x2f   :  { %428 = vmatpush.msrb.mxu3 %v216_v16  ;;  %230 = vmatpush.msra.mxu1 %v207_v29 }
  0x30   :  { %445 = vmatpush.msra.mxu2 %v207_v29 }
  0x31   :  { %430 = vmatpush.msrb.mxu3 %v215_v17  ;;  %231 = vmatpush.msra.mxu1 %v206_v31 }
  0x32   :  { %404 = vmatmul.msk.f32.gmra.mxu0 %vm125_vm0, %v106_v12  ;;  %410 = vmatmul.msk.f32.gmra.mxu3 %vm125_vm0, %v112_v13 }
  0x33   :  { %432 = vmatpush.msrb.mxu3 %v214_v20  ;;  %232 = vmatpush.msra.mxu1 %v205_v32 }
  0x34   :  { %447 = vmatpush.msra.mxu2 %v206_v31 }
  0x35   :  { %434 = vmatpush.msrb.mxu3 %v213_v21  ;;  %233 = vmatpush.msra.mxu1 %v204_v33 }
  0x36   :  { %449 = vmatpush.msra.mxu2 %v205_v32 }
  0x37   :  { %436 = vmatpush.msrb.mxu3 %v212_v22  ;;  %234 = vmatpush.msra.mxu1 %v203_v35 }
  0x38   :  { %451 = vmatpush.msra.mxu2 %v204_v33 }
  0x39   :  { %438 = vmatpush.msrb.mxu3 %v211_v23 }
  0x3a   :  { %405 = vmatmul.msk.f32.gmra.mxu0 %vm125_vm0, %v107_v18  ;;  %411 = vmatmul.msk.f32.gmra.mxu3 %vm125_vm0, %v113_v19 }
  0x3b   :  { %440 = vmatpush.msrb.mxu3 %v210_v26  ;;  %453 = vmatpush.msra.mxu2 %v203_v35 }
  0x3d   :  { %442 = vmatpush.msrb.mxu3 %v209_v27 }
  0x3f   :  { %444 = vmatpush.msrb.mxu3 %v208_v28 }
  0x41   :  { %446 = vmatpush.msrb.mxu3 %v207_v29 }
  0x42   :  { %406 = vmatmul.msk.f32.gmra.mxu0 %vm125_vm0, %v108_v24  ;;  %412 = vmatmul.msk.f32.gmra.mxu3 %vm125_vm0, %v114_v25 }
  0x43   :  { %448 = vmatpush.msrb.mxu3 %v206_v31 }
  0x45   :  { %450 = vmatpush.msrb.mxu3 %v205_v32 }
  0x47   :  { %452 = vmatpush.msrb.mxu3 %v204_v33 }
  0x49   :  { %454 = vmatpush.msrb.mxu3 %v203_v35 }
  0x4a   :  { %407 = vmatmul.msk.f32.gmra.mxu0 %vm125_vm0, %v109_v30 }
  0x52   :  { %408 = vmatmul.msk.f32.gmra.mxu0 %vm125_vm0, %v110_v34 }
  0xa7   :  { %v173_v36 = vpop.f32.mrf.mxu0 }
  0xa8   :  { %235 = vmatmul.f32.vlgmr.msra.gmra.mxu1 %v173_v36 }
  0xad   :  { %v191_v37 = vpop.f32.mrf.mxu3 }
  0xaf   :  { %v176_v38 = vpop.f32.mrf.mxu0 }
  0xb0   :  { %238 = vmatmul.f32.gmra.mxu1 %v176_v38 }
  0xb5   :  { %v194_v39 = vpop.f32.mrf.mxu3 }
  0xb7   :  { %v179_v40 = vpop.f32.mrf.mxu0 }
  0xb8   :  { %241 = vmatmul.f32.gmra.mxu1 %v179_v40 }
  0xbd   :  { %v197_v41 = vpop.f32.mrf.mxu3 }
  0xbf   :  { %v182_v42 = vpop.f32.mrf.mxu0 }
  0xc0   :  { %244 = vmatmul.f32.gmra.mxu1 %v182_v42 }
  0xc5   :  { %v200_v43 = vpop.f32.mrf.mxu3 }
  0xc6   :  { %262 = vmatmul.f32.vlgmr.msrb.gmra.mxu3 %v200_v43 }
  0xc7   :  { %v185_v44 = vpop.f32.mrf.mxu0 }
  0xc8   :  { %247 = vmatmul.f32.vlgmr.msra.gmra.mxu2 %v185_v44 }
  0xcf   :  { %v188_v45 = vpop.f32.mrf.mxu0 }
  0xd0   :  { %250 = vmatmul.f32.gmra.mxu2 %v188_v45 }
  0xd8   :  { %253 = vmatmul.f32.gmra.mxu2 %v191_v37 }
  0xe0   :  { %256 = vmatmul.f32.gmra.mxu2 %v194_v39 }
  0xe8   :  { %259 = vmatmul.f32.gmra.mxu2 %v197_v41 }
 0x125   :  { %v236_v46 = vpop.f32.mrf.mxu1 }
 0x126   :  { %v266_v52 = vmul.f32 %v236_v46, %v236_v46 }
 0x12d   :  { %v239_v47 = vpop.f32.mrf.mxu1 }
 0x12e   :  { %v267_v62 = vmul.f32 %v239_v47, %v239_v47 }
 0x135   :  { %v242_v49 = vpop.f32.mrf.mxu1 }
 0x136   :  { %v268_v51 = vmul.f32 %v242_v49, %v242_v49  ;;  %v270_v5 = vmul.f32 %v242_v49, %v236_v46 }
 0x138   :  { %v288_v54 = vadd.f32 %v268_v51, %v266_v52  ;;  %v278_v12 = vmul.f32 2.0, %v270_v5 }
 0x13a   :  { %v290_v59 = vadd.f32 0.0001, %v288_v54  ;;  %v280_v22 = vadd.f32 0.0001, %v278_v12 }
 0x13d   :  { %v245_v57 = vpop.f32.mrf.mxu1 }
 0x13e   :  { %v269_v60 = vmul.f32 %v245_v57, %v245_v57  ;;  %v271_v15 = vmul.f32 %v245_v57, %v239_v47 }
 0x140   :  { %v289_v1 = vadd.f32 %v269_v60, %v267_v62  ;;  %v279_v32 = vmul.f32 2.0, %v271_v15 }
 0x142   :  { %v291_v6 = vadd.f32 0.0001, %v289_v1  ;;  %v281_v39 = vadd.f32 0.0001, %v279_v32 }
 0x149   :  { %v263_v13 = vpop.f32.mrf.mxu3 }
 0x14a   :  { %v277_v19 = vsub.f32 %v263_v13, %v271_v15 }
 0x14b   :  { %v248_v48 = vpop.f32.mrf.mxu2 }
 0x14c   :  { %v272_v55 = vsub.f32 %v248_v48, %v266_v52  ;;  %v283_v28 = vmul.f32 2.0, %v277_v19 }
 0x14e   :  { %v285_v36 = vadd.f32 0.0009, %v283_v28 }
 0x150   :  { %v287_v42 = vmul.f32 %v285_v36, %v281_v39 }
 0x153   :  { %v251_v50 = vpop.f32.mrf.mxu2 }
 0x154   :  { %v273_v2 = vsub.f32 %v251_v50, %v267_v62 }
 0x15b   :  { %v254_v53 = vpop.f32.mrf.mxu2 }
 0x15c   :  { %v274_v56 = vsub.f32 %v254_v53, %v268_v51 }
 0x15e   :  { %v292_v58 = vadd.f32 %v274_v56, %v272_v55 }
 0x160   :  { %v294_v61 = vadd.f32 0.0009, %v292_v58 }
 0x162   :  { %v296_v63 = vmul.f32 %v294_v61, %v290_v59 }
 0x163   :  { %v257_v0 = vpop.f32.mrf.mxu2 }
 0x164   :  { %464 = vrcp.f32 %v296_v63  ;;  %v275_v3 = vsub.f32 %v257_v0, %v269_v60  ;;  %v309_v18 = vand.u32 2147483648, %v296_v63  ;;  %v307_v21 = vand.u32 2147483647, %v296_v63 }
 0x165   :  { %vm303_vm2 = vweird.f32 %v296_v63 }
 0x166   :  { %v293_v4 = vadd.f32 %v275_v3, %v273_v2  ;;  %v310_v27 = vor.u32 1.1754944e-38, %v309_v18  ;;  %vm308_vm4 = vcmp.eq.f32.partialorder %v307_v21, 8.507059e+37 }
 0x168   :  { %v295_v7 = vadd.f32 0.0009, %v293_v4 }
 0x16a   :  { %v465_v8 = vpop.eup %464  ;;  %v297_v9 = vmul.f32 %v295_v7, %v291_v6 }
 0x16b   :  { %v299_v10 = vmul.f32 %v465_v8, %v296_v63  ;;  %v260_v11 = vpop.f32.mrf.mxu2  ;;  %vm304_vm1 = vweird.f32 %v465_v8 }
 0x16c   :  { %466 = vrcp.f32 %v297_v9  ;;  %v276_v14 = vsub.f32 %v260_v11, %v270_v5  ;;  %vm305_vm3 = vmor %vm303_vm2, %vm304_vm1  ;;  %v324_v35 = vand.u32 2147483648, %v297_v9  ;;  %v322_v38 = vand.u32 2147483647, %v297_v9 }
 0x16d   :  { %v300_v16 = vsub.f32 1.0, %v299_v10  ;;  %vm318_vm6 = vweird.f32 %v297_v9 }
 0x16e   :  { %v282_v17 = vmul.f32 2.0, %v276_v14  ;;  %v325_v41 = vor.u32 1.1754944e-38, %v324_v35  ;;  %vm323_vm8 = vcmp.eq.f32.partialorder %v322_v38, 8.507059e+37 }
 0x16f   :  { %v301_v20 = vmul.f32 %v465_v8, %v300_v16 }
 0x170   :  { %v284_v23 = vadd.f32 0.0009, %v282_v17 }
 0x171   :  { %v302_v24 = vadd.f32 %v465_v8, %v301_v20 }
 0x172   :  { %v467_v25 = vpop.eup %466  ;;  %v286_v26 = vmul.f32 %v284_v23, %v280_v22 }
 0x173   :  { %v314_v29 = vmul.f32 %v467_v25, %v297_v9  ;;  %v306_v30 = vsel %vm305_vm3, %v465_v8, %v302_v24  ;;  %vm319_vm5 = vweird.f32 %v467_v25 }
 0x174   :  { %v311_v31 = vsel %vm308_vm4, %v310_v27, %v306_v30  ;;  %vm320_vm7 = vmor %vm318_vm6, %vm319_vm5 }
 0x175   :  { %v315_v33 = vsub.f32 1.0, %v314_v29  ;;  %v312_v34 = vmul.f32 %v311_v31, %v286_v26 }
 0x177   :  { %v316_v37 = vmul.f32 %v467_v25, %v315_v33  ;;  %328 = vst [vmem:[#allocation11] sm:$0xff] %v312_v34 }
 0x179   :  { %v317_v40 = vadd.f32 %v467_v25, %v316_v37 }
 0x17b   :  { %v321_v43 = vsel %vm320_vm7, %v467_v25, %v317_v40 }
 0x17c   :  { %v326_v44 = vsel %vm323_vm8, %v325_v41, %v321_v43 }
 0x17d   :  { %v327_v45 = vmul.f32 %v326_v44, %v287_v42 }
 0x17f   :  { %v330_v46 = vmin.f32 %v312_v34, %v327_v45  ;;  %329 = vst [vmem:[#allocation11 + $0x8] sm:$0xff] %v327_v45  ;;  %v337_v47 = vmax.f32 %v312_v34, %v327_v45 }
 0x180   :  { %363 = dma.vmem_to_hbm [thread:$0]  %s356_s19, 256, %s358_s17, [#allocation5], %s647_s29, %s647_s29, %s648_s30  }
 0x181   :  { %v331_v48 = vrot.slane %v330_v46, 4  ;;  %v338_v49 = vrot.slane %v337_v47, 4 }
 0x183   :  { %v332_v50 = vmin.f32 %v330_v46, %v331_v48  ;;  %v339_v51 = vmax.f32 %v337_v47, %v338_v49 }
 0x185   :  { %v333_v52 = vrot.slane %v332_v50, 2  ;;  %v340_v54 = vrot.slane %v339_v51, 2 }
 0x187   :  { %v334_v53 = vmin.f32 %v332_v50, %v333_v52  ;;  %v341_v57 = vmax.f32 %v339_v51, %v340_v54 }
 0x189   :  { %v335_v55 = vrot.slane %v334_v53, 1  ;;  %v342_v58 = vrot.slane %v341_v57, 1 }
 0x18b   :  { %v336_v56 = vmin.f32 %v334_v53, %v335_v55  ;;  %v343_v59 = vmax.f32 %v341_v57, %v342_v58 }
 0x18d   :  { %344 = vmin.xlane.f32.xlu0 %v336_v56 }
 0x195   :  { %348 = vmax.xlane.f32.xlu0 %v343_v59 }
 0x200   :  { %v345_v60 = vpop.xlane.xlu0 %344 }
 0x201   :  { %347 = vst.msk [vmem:[#allocation12] sm:$0x1] %vm346_vm9, %v345_v60 }
 0x202   :  { %374 = dma.vmem_to_hbm [thread:$0]  %s370_s21, 16, %s372_s4, [#allocation13]  }
 0x208   :  { %v349_v61 = vpop.xlane.xlu0 %348 }
 0x209   :  { %350 = vst.msk [vmem:[#allocation14] sm:$0x1] %vm346_vm9, %v349_v61 }
 0x20a   :  { %385 = dma.vmem_to_hbm [thread:$0]  %s381_s25, 16, %s383_s28, [#allocation13]  }
 0x20b   :  { %642 = dma.done.wait [#allocation5], 256  }
 0x20c   :  { %643 = vsyncadd [#allocation5], 4294967040 }
 0x20d   :  { %644 = dma.done.wait [#allocation13], 32  }
 0x20e   :  { %645 = vsyncadd [#allocation13], 4294967264 }
 0x20f   :  { %398 = vsyncpa [#allocation4], 1 }
 0x210   :  { %399 = vsyncpa [#allocation7], 1 }
 0x211   :  { %400 = vsyncpa [#allocation10], 1 }
 0x212   :  { %401 = vsyncpa [#allocation5], 1 }
 0x213   :  { %402 = vsyncpa [#allocation13], 1 }

</bundles_post_ra>
